<compile_context>
chip_gen: v7x
topology: tpu7x:2x2x1
jax: 0.10.0
libtpu: 0.0.40
codegen_flags: <defaults>
</compile_context>

<pallas_src>
import functools

import jax
import jax.numpy as jnp
from jax.experimental import pallas as pl
from jax.experimental.pallas import tpu as pltpu


def _compute_hidden(hidden_size, multiple_of, ffn_dim_multiplier):
    hidden_size = int(2 * hidden_size / 3)
    if ffn_dim_multiplier is not None:
        hidden_size = int(ffn_dim_multiplier * hidden_size)
    hidden_size = multiple_of * ((hidden_size + multiple_of - 1) // multiple_of)
    return hidden_size


def _round_up(x, m):
    return ((x + m - 1) // m) * m


def _pick_hidden_tile(H, target):
    """Largest divisor of H that is a multiple of 128 and <= target (else H)."""
    if H <= target:
        return H
    t = target - (target % 128)
    while t >= 128:
        if H % t == 0:
            return t
        t -= 128
    return H


def _device_tile_config():
    """Generation-aware tile / VMEM-limit selection."""
    vmem_bytes = None
    try:
        vmem_bytes = pltpu.get_tpu_info().vmem_capacity_bytes
    except Exception:
        vmem_bytes = None
    if vmem_bytes is None:
        # Conservative fallback (works on all generations).
        return dict(tm=512, th_target=512, vmem_limit_bytes=48 * 1024 * 1024)
    if vmem_bytes >= 100 * 1024 * 1024:
        # v5e / v6e: 128 MiB physical VMEM -> large token tile, high intensity.
        return dict(tm=1024, th_target=512, vmem_limit_bytes=96 * 1024 * 1024)
    # v7x: 64 MiB VMEM per TensorCore -> keep footprint under ~52 MiB.
    return dict(tm=512, th_target=512, vmem_limit_bytes=52 * 1024 * 1024)


def _ffn_kernel(x_ref, w1a_ref, w1b_ref, w2_ref, o_ref, acc_ref):
    # x_ref:   (tm, D)   bf16 token tile (constant across the hidden axis)
    # w1a_ref: (D, th)   bf16 silu-branch projection tile  (W1 columns [:H])
    # w1b_ref: (D, th)   bf16 gate-branch projection tile  (W1 columns [H:])
    # w2_ref:  (th, D)   bf16 down-projection tile
    # o_ref:   (tm, D)   output tile (resident across the hidden axis)
    # acc_ref: (tm, D)   f32 VMEM accumulator
    k = pl.program_id(1)

    @pl.when(k == 0)
    def _():
        acc_ref[...] = jnp.zeros_like(acc_ref)

    x = x_ref[...]
    g = jnp.dot(x, w1a_ref[...], preferred_element_type=jnp.float32)  # silu branch
    u = jnp.dot(x, w1b_ref[...], preferred_element_type=jnp.float32)  # gate branch
    act = (g * jax.nn.sigmoid(g)) * u                                  # f32 SwiGLU
    acc_ref[...] += jnp.dot(act.astype(w2_ref.dtype), w2_ref[...],
                            preferred_element_type=jnp.float32)

    @pl.when(k == pl.num_programs(1) - 1)
    def _():
        o_ref[...] = acc_ref[...].astype(o_ref.dtype)


@functools.partial(
    jax.jit,
    static_argnames=("tm", "th_target", "vmem_limit_bytes", "compute_dtype"))
def _feed_forward_impl(x, w1_t, w2_t, *, tm, th_target, vmem_limit_bytes,
                       compute_dtype):
    N, D = x.shape
    H2 = w1_t.shape[1]
    H = H2 // 2
    assert w2_t.shape == (H, D)
    out_dtype = x.dtype

    # Activations cast per call (cheap); weights should already be in
    # compute_dtype (pre-cast once, outside this jitted call) -> no-op astype.
    xc = x.astype(compute_dtype)
    w1c = w1_t.astype(compute_dtype)
    w2c = w2_t.astype(compute_dtype)

    # Token tile: multiple of 16 (bf16 (16,128) sublane packing), at most `tm`;
    # pad N up to a multiple of it.  Zero rows: silu(0)*0 = 0 -> zero output rows.
    tm_eff = min(tm, _round_up(N, 16))
    tm_eff = max(16, tm_eff - (tm_eff % 16))
    Np = _round_up(N, tm_eff)
    if Np != N:
        xc = jnp.pad(xc, ((0, Np - N), (0, 0)))

    th = _pick_hidden_tile(H, th_target)
    grid = (Np // tm_eff, H // th)
    gate_block_off = H // th  # block-index offset into fused W1 for the gate half

    itemsize = jnp.dtype(compute_dtype).itemsize
    n_token_tiles = Np // tm_eff
    cost = pl.CostEstimate(
        flops=6 * Np * D * H,                       # two up-proj + one down-proj
        transcendentals=Np * H,                     # sigmoid
        bytes_accessed=(Np * D * itemsize                      # x
                        + n_token_tiles * 3 * D * H * itemsize  # weights re-streamed
                        + Np * D * jnp.dtype(out_dtype).itemsize),
    )

    out = pl.pallas_call(
        _ffn_kernel,
        out_shape=jax.ShapeDtypeStruct((Np, D), out_dtype),
        grid_spec=pltpu.PrefetchScalarGridSpec(
            num_scalar_prefetch=0,
            grid=grid,
            in_specs=[
                pl.BlockSpec((tm_eff, D), lambda i, k: (i, 0)),
                # Fused W1 passed twice: silu half then gate half (offset index map).
                pl.BlockSpec((D, th), lambda i, k: (0, k)),
                pl.BlockSpec((D, th),
                             lambda i, k, _off=gate_block_off: (0, k + _off)),
                pl.BlockSpec((th, D), lambda i, k: (k, 0)),
            ],
            out_specs=pl.BlockSpec((tm_eff, D), lambda i, k: (i, 0)),
            scratch_shapes=[pltpu.VMEM((tm_eff, D), jnp.float32)],
        ),
        compiler_params=pltpu.CompilerParams(
            dimension_semantics=("parallel", "arbitrary"),
            vmem_limit_bytes=vmem_limit_bytes,
        ),
        cost_estimate=cost,
    )(xc, w1c, w1c, w2c)

    return out[:N] if Np != N else out


def feed_forward(x, w1_t, w2_t, *, tm=None, th_target=None,
                 vmem_limit_bytes=None, compute_dtype=jnp.bfloat16):
    """SwiGLU FFN.

    x:    [N, D]   tokens
    w1_t: [D, 2H]  fused gate/up projection, already transposed (PyTorch w1.weight.T)
    w2_t: [H, D]   down projection, already transposed (PyTorch w2.weight.T)
    returns [N, D] in x.dtype

    For best performance pre-cast w1_t / w2_t to `compute_dtype` once, outside
    the per-step call (avoids a per-call HBM->HBM copy of the weights).
    """
    cfg = _device_tile_config()
    tm = cfg["tm"] if tm is None else tm
    th_target = cfg["th_target"] if th_target is None else th_target
    vmem_limit_bytes = (cfg["vmem_limit_bytes"]
                        if vmem_limit_bytes is None else vmem_limit_bytes)
    return _feed_forward_impl(x, w1_t, w2_t, tm=tm, th_target=th_target,
                              vmem_limit_bytes=vmem_limit_bytes,
                              compute_dtype=compute_dtype)


def feed_forward_ref(x, w1_t, w2_t, compute_dtype=jnp.bfloat16):
    """Reference with the same bf16-operand / f32-accumulation recipe."""
    H = w2_t.shape[0]
    xc = x.astype(compute_dtype)
    h_a = jnp.dot(xc, w1_t[:, :H].astype(compute_dtype),
                  preferred_element_type=jnp.float32)
    h_b = jnp.dot(xc, w1_t[:, H:].astype(compute_dtype),
                  preferred_element_type=jnp.float32)
    act = jax.nn.silu(h_a) * h_b
    out = jnp.dot(act.astype(compute_dtype), w2_t.astype(compute_dtype),
                  preferred_element_type=jnp.float32)
    return out.astype(x.dtype)


def feed_forward_ref_f32(x, w1_t, w2_t):
    h = x @ w1_t
    H = w2_t.shape[0]
    x_half, gate = h[:, :H], h[:, H:]
    return (jax.nn.silu(x_half) * gate) @ w2_t


if __name__ == "__main__":
    # Module config (small but tile-friendly):
    in_features = 128
    hidden_size_arg = 192          # -> int(2*192/3)=128 -> rounded to multiple_of=128
    multiple_of = 128
    ffn_dim_multiplier = None
    H = _compute_hidden(hidden_size_arg, multiple_of, ffn_dim_multiplier)  # 128

    batch, seq = 2, 8
    N = batch * seq

    key = jax.random.PRNGKey(0)
    kx, kw1, kw2 = jax.random.split(key, 3)

    # PyTorch Linear weights are (out, in); build them already transposed to (in, out).
    x = jax.random.normal(kx, (batch, seq, in_features), dtype=jnp.float32)
    w1_t = jax.random.normal(kw1, (in_features, 2 * H), dtype=jnp.float32) * 0.02
    w2_t = jax.random.normal(kw2, (H, in_features), dtype=jnp.float32) * 0.02

    # Pre-cast weights once (as would be done at model-load time).
    w1_bf16 = w1_t.astype(jnp.bfloat16)
    w2_bf16 = w2_t.astype(jnp.bfloat16)

    x_flat = x.reshape(N, in_features)
    out = feed_forward(x_flat, w1_bf16, w2_bf16)
    out = jax.block_until_ready(out).reshape(batch, seq, in_features)

    # Bit-recipe-matched reference (same bf16 operands, f32 accumulation).
    ref = feed_forward_ref(x_flat, w1_t, w2_t).reshape(batch, seq, in_features)
    assert jnp.allclose(out, ref, atol=1e-2, rtol=1e-2), "mismatch vs bf16 reference"

    # Loose check against the pure-f32 PyTorch-semantics reference.
    ref32 = feed_forward_ref_f32(x_flat, w1_t, w2_t).reshape(batch, seq, in_features)
    assert jnp.allclose(out, ref32, atol=5e-2, rtol=5e-2), "mismatch vs f32 reference"

    print("KERNEL_OK")
</pallas_src>

<mosaic_0001>
module attributes {stable_mosaic.version = 11 : i64} {
  func.func @_ffn_kernel(%arg0: i32, %arg1: i32, %arg2: memref<16x128xbf16, #tpu.memory_space<vmem>>, %arg3: memref<128x128xbf16, #tpu.memory_space<vmem>>, %arg4: memref<128x128xbf16, #tpu.memory_space<vmem>>, %arg5: memref<128x128xbf16, #tpu.memory_space<vmem>>, %arg6: memref<16x128xf32, #tpu.memory_space<vmem>>, %arg7: memref<16x128xf32, #tpu.memory_space<vmem>>) attributes {dimension_semantics = [#tpu.dimension_semantics<parallel>, #tpu.dimension_semantics<arbitrary>], iteration_bounds = array<i64: 1, 1>, scalar_prefetch = 0 : i64, scratch_operands = 1 : i64, tpu.core_type = #tpu.core_type<tc>, window_params = [{transform_indices = @transform_0, window_bounds = array<i64: 16, 128>}, {transform_indices = @transform_1, window_bounds = array<i64: 128, 128>}, {transform_indices = @transform_2, window_bounds = array<i64: 128, 128>}, {transform_indices = @transform_3, window_bounds = array<i64: 128, 128>}, {transform_indices = @transform_4, window_bounds = array<i64: 16, 128>}]} {
    %c0_i32 = arith.constant 0 : i32
    %0 = arith.cmpi eq, %arg1, %c0_i32 : i32
    %1 = arith.extui %0 : i1 to i32
    %c0_i32_0 = arith.constant 0 : i32
    %2 = arith.cmpi ne, %1, %c0_i32_0 : i32
    scf.if %2 {
      %cst_17 = arith.constant 0.000000e+00 : f32
      %24 = vector.broadcast %cst_17 : f32 to vector<16x128xf32>
      %c0_18 = arith.constant 0 : index
      %c0_19 = arith.constant 0 : index
      %25 = vector.load %arg7[%c0_18, %c0_19] : memref<16x128xf32, #tpu.memory_space<vmem>>, vector<16x128xf32>
      tpu.vector_store %arg7[%c0_18, %c0_19], %24 {strides = array<i32>} : memref<16x128xf32, #tpu.memory_space<vmem>>, vector<16x128xf32>,
    } else {
    }
    %c0 = arith.constant 0 : index
    %c0_1 = arith.constant 0 : index
    %3 = vector.load %arg2[%c0, %c0_1] : memref<16x128xbf16, #tpu.memory_space<vmem>>, vector<16x128xbf16>
    %c0_2 = arith.constant 0 : index
    %c0_3 = arith.constant 0 : index
    %4 = vector.load %arg3[%c0_2, %c0_3] : memref<128x128xbf16, #tpu.memory_space<vmem>>, vector<128x128xbf16>
    %cst = arith.constant dense<0.000000e+00> : vector<16x128xf32>
    %5 = tpu.matmul %3, %4, %cst {dimension_numbers = #tpu.dot_dimension_numbers<[1], [0], [0], [1], [0, 0, 1, 1], [], []>} : vector<16x128xbf16>, vector<128x128xbf16>, vector<16x128xf32> -> vector<16x128xf32>
    %c0_4 = arith.constant 0 : index
    %c0_5 = arith.constant 0 : index
    %6 = vector.load %arg4[%c0_4, %c0_5] : memref<128x128xbf16, #tpu.memory_space<vmem>>, vector<128x128xbf16>
    %cst_6 = arith.constant dense<0.000000e+00> : vector<16x128xf32>
    %7 = tpu.matmul %3, %6, %cst_6 {dimension_numbers = #tpu.dot_dimension_numbers<[1], [0], [0], [1], [0, 0, 1, 1], [], []>} : vector<16x128xbf16>, vector<128x128xbf16>, vector<16x128xf32> -> vector<16x128xf32>
    %8 = arith.negf %5 : vector<16x128xf32>
    %9 = math.exp %8 : vector<16x128xf32>
    %cst_7 = arith.constant 1.000000e+00 : f32
    %10 = vector.broadcast %cst_7 : f32 to vector<16x128xf32>
    %11 = arith.addf %10, %9 : vector<16x128xf32>
    %12 = arith.divf %10, %11 : vector<16x128xf32>
    %13 = arith.mulf %5, %12 : vector<16x128xf32>
    %14 = arith.mulf %13, %7 : vector<16x128xf32>
    %c0_8 = arith.constant 0 : index
    %c0_9 = arith.constant 0 : index
    %15 = vector.load %arg7[%c0_8, %c0_9] : memref<16x128xf32, #tpu.memory_space<vmem>>, vector<16x128xf32>
    %16 = arith.truncf %14 : vector<16x128xf32> to vector<16x128xbf16>
    %c0_10 = arith.constant 0 : index
    %c0_11 = arith.constant 0 : index
    %17 = vector.load %arg5[%c0_10, %c0_11] : memref<128x128xbf16, #tpu.memory_space<vmem>>, vector<128x128xbf16>
    %cst_12 = arith.constant dense<0.000000e+00> : vector<16x128xf32>
    %18 = tpu.matmul %16, %17, %cst_12 {dimension_numbers = #tpu.dot_dimension_numbers<[1], [0], [0], [1], [0, 0, 1, 1], [], []>} : vector<16x128xbf16>, vector<128x128xbf16>, vector<16x128xf32> -> vector<16x128xf32>
    %19 = arith.addf %15, %18 : vector<16x128xf32>
    %c0_13 = arith.constant 0 : index
    %c0_14 = arith.constant 0 : index
    %20 = vector.load %arg7[%c0_13, %c0_14] : memref<16x128xf32, #tpu.memory_space<vmem>>, vector<16x128xf32>
    tpu.vector_store %arg7[%c0_13, %c0_14], %19 {strides = array<i32>} : memref<16x128xf32, #tpu.memory_space<vmem>>, vector<16x128xf32>,
    %c0_i32_15 = arith.constant 0 : i32
    %21 = arith.cmpi eq, %arg1, %c0_i32_15 : i32
    %22 = arith.extui %21 : i1 to i32
    %c0_i32_16 = arith.constant 0 : i32
    %23 = arith.cmpi ne, %22, %c0_i32_16 : i32
    scf.if %23 {
      %c0_17 = arith.constant 0 : index
      %c0_18 = arith.constant 0 : index
      %24 = vector.load %arg7[%c0_17, %c0_18] : memref<16x128xf32, #tpu.memory_space<vmem>>, vector<16x128xf32>
      %c0_19 = arith.constant 0 : index
      %c0_20 = arith.constant 0 : index
      %25 = vector.load %arg6[%c0_19, %c0_20] : memref<16x128xf32, #tpu.memory_space<vmem>>, vector<16x128xf32>
      tpu.vector_store %arg6[%c0_19, %c0_20], %24 {strides = array<i32>} : memref<16x128xf32, #tpu.memory_space<vmem>>, vector<16x128xf32>,
    } else {
    }
    return
  }
  func.func @transform_0(%arg0: i32, %arg1: i32) -> (i32, i32) {
    %c0_i32 = arith.constant 0 : i32
    %c0_i32_0 = arith.constant 0 : i32
    return %arg0, %c0_i32 : i32, i32
  }
  func.func @transform_1(%arg0: i32, %arg1: i32) -> (i32, i32) {
    %c0_i32 = arith.constant 0 : i32
    %c0_i32_0 = arith.constant 0 : i32
    return %c0_i32, %arg1 : i32, i32
  }
  func.func @transform_2(%arg0: i32, %arg1: i32) -> (i32, i32) {
    %c1_i32 = arith.constant 1 : i32
    %0 = arith.addi %arg1, %c1_i32 : i32
    %c0_i32 = arith.constant 0 : i32
    %c0_i32_0 = arith.constant 0 : i32
    return %c0_i32, %0 : i32, i32
  }
  func.func @transform_3(%arg0: i32, %arg1: i32) -> (i32, i32) {
    %c0_i32 = arith.constant 0 : i32
    %c0_i32_0 = arith.constant 0 : i32
    return %arg1, %c0_i32 : i32, i32
  }
  func.func @transform_4(%arg0: i32, %arg1: i32) -> (i32, i32) {
    %c0_i32 = arith.constant 0 : i32
    %c0_i32_0 = arith.constant 0 : i32
    return %arg0, %c0_i32 : i32, i32
  }
}

</mosaic_0001>

<bundles_post_ra>
// kernel: _feed_forward_impl.1
= control target key start
LH: loop header
LB: loop body
LE: loop exit
PB: predicated region body
PF: predicated region fallthrough
CT: control target
= control target key end

     0   :  { %9 = vsyncpa [#allocation4], 0  ;;  %s839_s0 = inlined_call_operand.vmem [shape: bf16[16,128], index: 0, kind: input, shape index: {}]   ;;  %s840_s1 = inlined_call_operand.hbm [shape: bf16[128,256], index: 1, kind: input, shape index: {}, may-alias: {1,2}]   ;;  %s841_s2 = inlined_call_operand.hbm [shape: bf16[128,256], index: 2, kind: input, shape index: {}, may-alias: {1,2}]   ;;  %s842_s3 = inlined_call_operand.hbm [shape: bf16[128,128], index: 3, kind: input, shape index: {}]   ;;  %s843_s4 = inlined_call_operand.hbm [shape: f32[16,128], index: 4, kind: output, shape index: {}]  }
   0x1   :  { %10 = vsyncpa [#allocation7], 0 }
   0x2   :  { %11 = vsyncpa [#allocation5], 0  ;;  %s734_s17 = scalar_lea.hbm %s841_s2, 64  ;;  %s696_s18 = smov [#allocation6]  }
   0x3   :  { %s34_s19 = sshll.u32 %s696_s18, 4  ;;  %s697_s20 = smov [#allocation3]   ;;  %s35_s19 = int_to_ptr.vmem [resolvable:$true] %s34_s19 }
   0x4   :  { %s19_s21 = sshll.u32 %s697_s20, 4  ;;  %s623_s24 = scalar_lea.hbm %s841_s2, 1088  ;;  %s736_s21 = int_to_ptr.vmem [resolvable:$true] %s19_s21 }
   0x5   :  { %p600_p0 = scmp.ne.s32.totalorder %s734_s17, %s623_s24  ;;  %s601_s27 = scalar_lea.hbm %s841_s2, 2048 }
   0x6   :  { %p602_p1 = scmp.lt.u32.totalorder %s734_s17, %s841_s2  ;;  %p603_p2 = scmp.lt.u32.totalorder %s601_s27, %s623_s24 }
   0x7   :  { %p605_p4 = scmp.lt.u32.totalorder %s623_s24, %s734_s17 }
   0x8   :  { %p604_p3 = por %p603_p2, %p602_p1 }
   0xa   :  { %p606_p5 = por %p605_p4, %p604_p3 }
   0xc   :  { %p607_p6 = pnand %p606_p5, %p600_p0 }
   0xe   :  { %610 = shalt.err (!%p607_p6)
}
   0xf   :  { %s611_s30 = scalar_lea.vmem %s35_s19, 1024  ;;  %p616_p8 = scmp.lt.s32.totalorder %s35_s19, %s35_s19 }
  0x10   :  { %p612_p7 = scmp.ne.s32.totalorder %s35_s19, %s611_s30  ;;  %p617_p9 = scmp.lt.s32.totalorder %s611_s30, %s611_s30 }
  0x12   :  { %p618_p10 = por %p617_p9, %p616_p8 }
  0x14   :  { %p619_p11 = pnand %p618_p10, %p612_p7 }
  0x16   :  { %622 = shalt.err (!%p619_p11)
}
  0x17   :  { %s698_s5 = smov 128   ;;  %s699_s6 = smov 64  }
  0x18   :  { %s700_s7 = smov 4   ;;  %s624_s9 = scalar_lea.hbm %s840_s1, 1024 }
  0x19   :  { %40 = dma.hbm_to_vmem [thread:$0]  %s734_s17, 1024, %s35_s19, [#allocation7], %s698_s5, %s699_s6, %s700_s7  }
  0x1a   :  { %p625_p12 = scmp.ne.s32.totalorder %s840_s1, %s624_s9  ;;  %s626_s14 = scalar_lea.hbm %s840_s1, 2048 }
  0x1b   :  { %p627_p13 = scmp.lt.u32.totalorder %s626_s14, %s624_s9  ;;  %p628_p0 = scmp.lt.u32.totalorder %s624_s9, %s840_s1 }
  0x1d   :  { %p629_p1 = por %p628_p0, %p627_p13 }
  0x1f   :  { %p630_p2 = pnand %p629_p1, %p625_p12 }
  0x21   :  { %633 = shalt.err (!%p630_p2)
}
  0x22   :  { %s634_s17 = scalar_lea.vmem %s736_s21, 1024  ;;  %p639_p4 = scmp.lt.s32.totalorder %s736_s21, %s736_s21 }
  0x23   :  { %p635_p3 = scmp.ne.s32.totalorder %s736_s21, %s634_s17  ;;  %p640_p5 = scmp.lt.s32.totalorder %s634_s17, %s634_s17 }
  0x25   :  { %p641_p6 = por %p640_p5, %p639_p4 }
  0x27   :  { %p642_p7 = pnand %p641_p6, %p635_p3 }
  0x29   :  { %645 = shalt.err (!%p642_p7)
}
  0x2a   :  { %25 = dma.hbm_to_vmem [thread:$0]  %s840_s1, 1024, %s736_s21, [#allocation4], %s698_s5, %s699_s6, %s700_s7  }
  0x2b   :  { %s701_s20 = smov [#allocation8]   ;;  %s646_s25 = scalar_lea.hbm %s842_s3, 1024 }
  0x2c   :  { %s46_s22 = sshll.u32 %s701_s20, 4  ;;  %p647_p8 = scmp.ne.s32.totalorder %s842_s3, %s646_s25  ;;  %s47_s22 = int_to_ptr.vmem [resolvable:$true] %s46_s22 }
  0x2d   :  { %p650_p9 = scmp.lt.u32.totalorder %s646_s25, %s842_s3 }
  0x2f   :  { %p652_p10 = pnand %p650_p9, %p647_p8 }
  0x31   :  { %655 = shalt.err (!%p652_p10)
}
  0x32   :  { %s656_s30 = scalar_lea.vmem %s47_s22, 1024  ;;  %p661_p12 = scmp.lt.s32.totalorder %s47_s22, %s47_s22 }
  0x33   :  { %p657_p11 = scmp.ne.s32.totalorder %s47_s22, %s656_s30  ;;  %p662_p13 = scmp.lt.s32.totalorder %s656_s30, %s656_s30 }
  0x35   :  { %p663_p0 = por %p662_p13, %p661_p12 }
  0x37   :  { %p664_p1 = pnand %p663_p0, %p657_p11 }
  0x39   :  { %667 = shalt.err (!%p664_p1)
}
  0x3a   :  { %52 = dma.hbm_to_vmem [thread:$0]  %s842_s3, 1024, %s47_s22, [#allocation7], %s699_s6, %s699_s6, %s700_s7  }
  0x3b   :  { %690 = dma.done.wait [#allocation4], 1024  }
  0x3c   :  { %691 = vsyncadd [#allocation4], 4294966272 }
  0x3d   :  { %692 = dma.done.wait [#allocation7], 2048  }
  0x3e   :  { %693 = vsyncadd [#allocation7], 4294965248  ;;  %v702_v0 = vmov 0.0   ;;  %vm703_vm0 = vmmov 0   ;;  %v566_v1 = vld [vmem:[#allocation3] sm:$0xff]   ;;  %v567_v2 = vld [vmem:[#allocation3 + $0x8] sm:$0xff]  }
  0x3f   :  { %496 = vmatprep.subr.bf16.mxu0 %v702_v0  ;;  %516 = vmatprep.subr.bf16.mxu1 %v702_v0  ;;  %v568_v3 = vld [vmem:[#allocation3 + $0x10] sm:$0xff]   ;;  %v573_v4 = vld [vmem:[#allocation6] sm:$0xff]   ;;  %v575_v5 = vld [vmem:[#allocation6 + $0x8] sm:$0xff]  }
  0x40   :  { %512 = vmatprep.mubr.msk.bf16.mxu0 %vm703_vm0, %v702_v0  ;;  %532 = vmatprep.mubr.msk.bf16.mxu1 %vm703_vm0, %v702_v0  ;;  %v569_v6 = vld [vmem:[#allocation3 + $0x18] sm:$0xff]   ;;  %v577_v7 = vld [vmem:[#allocation6 + $0x10] sm:$0xff]   ;;  %v570_v8 = vld [vmem:[#allocation3 + $0x20] sm:$0xff]  }
  0x41   :  { %497 = vmatpush3.bf16.msra.mxu0 %v566_v1  ;;  %517 = vmatpush3.bf16.msra.mxu1 %v573_v4  ;;  %v571_v9 = vld [vmem:[#allocation3 + $0x28] sm:$0xff]   ;;  %v578_v10 = vld [vmem:[#allocation6 + $0x18] sm:$0xff]   ;;  %v579_v11 = vld [vmem:[#allocation6 + $0x20] sm:$0xff]  }
  0x42   :  { %498 = vmatprep.subr.bf16.mxu0 %v702_v0  ;;  %518 = vmatprep.subr.bf16.mxu1 %v702_v0  ;;  %v572_v12 = vld [vmem:[#allocation3 + $0x30] sm:$0xff]   ;;  %v580_v13 = vld [vmem:[#allocation6 + $0x28] sm:$0xff]   ;;  %v574_v14 = vld [vmem:[#allocation3 + $0x38] sm:$0xff]  }
  0x43   :  { %v576_v15 = vld [vmem:[%s839_s0] sm:$0xff]   ;;  %v581_v16 = vld [vmem:[#allocation6 + $0x30] sm:$0xff]   ;;  %v583_v18 = vld [vmem:[#allocation8] sm:$0xff]   ;;  %s704_s0 = smov [#allocation9]  }
  0x44   :  { %v582_v17 = vld [vmem:[#allocation6 + $0x38] sm:$0xff]   ;;  %v584_v19 = vld [vmem:[#allocation8 + $0x8] sm:$0xff]   ;;  %v585_v20 = vld [vmem:[#allocation8 + $0x10] sm:$0xff]   ;;  %s428_s7 = sshll.u32 %s704_s0, 4  ;;  %s429_s7 = int_to_ptr.vmem [resolvable:$true] %s428_s7 }
  0x45   :  { %499 = vmatpush3.bf16.msra.mxu0 %v567_v2  ;;  %519 = vmatpush3.bf16.msra.mxu1 %v575_v5  ;;  %v586_v21 = vld [vmem:[#allocation8 + $0x18] sm:$0xff]   ;;  %v587_v22 = vld [vmem:[#allocation8 + $0x20] sm:$0xff]   ;;  %v588_v23 = vld [vmem:[#allocation8 + $0x28] sm:$0xff]   ;;  %s668_s2 = scalar_lea.vmem %s429_s7, 256  ;;  %p673_p3 = scmp.lt.s32.totalorder %s429_s7, %s429_s7 }
  0x46   :  { %500 = vmatprep.subr.bf16.mxu0 %v702_v0  ;;  %520 = vmatprep.subr.bf16.mxu1 %v702_v0  ;;  %v589_v24 = vld [vmem:[#allocation8 + $0x30] sm:$0xff]   ;;  %v590_v25 = vld [vmem:[#allocation8 + $0x38] sm:$0xff]   ;;  %p669_p2 = scmp.ne.s32.totalorder %s429_s7, %s668_s2  ;;  %p674_p4 = scmp.lt.s32.totalorder %s668_s2, %s668_s2 }
  0x48   :  { %p675_p5 = por %p674_p4, %p673_p3 }
  0x49   :  { %501 = vmatpush3.bf16.msra.mxu0 %v568_v3  ;;  %521 = vmatpush3.bf16.msra.mxu1 %v577_v7 }
  0x4a   :  { %502 = vmatprep.subr.bf16.mxu0 %v702_v0  ;;  %522 = vmatprep.subr.bf16.mxu1 %v702_v0  ;;  %p676_p6 = pnand %p675_p5, %p669_p2 }
  0x4d   :  { %503 = vmatpush3.bf16.msra.mxu0 %v569_v6  ;;  %523 = vmatpush3.bf16.msra.mxu1 %v578_v10 }
  0x4e   :  { %504 = vmatprep.subr.bf16.mxu0 %v702_v0  ;;  %524 = vmatprep.subr.bf16.mxu1 %v702_v0 }
  0x51   :  { %505 = vmatpush3.bf16.msra.mxu0 %v570_v8  ;;  %525 = vmatpush3.bf16.msra.mxu1 %v579_v11 }
  0x52   :  { %506 = vmatprep.subr.bf16.mxu0 %v702_v0  ;;  %526 = vmatprep.subr.bf16.mxu1 %v702_v0 }
  0x55   :  { %507 = vmatpush3.bf16.msra.mxu0 %v571_v9  ;;  %527 = vmatpush3.bf16.msra.mxu1 %v580_v13 }
  0x56   :  { %508 = vmatprep.subr.bf16.mxu0 %v702_v0  ;;  %528 = vmatprep.subr.bf16.mxu1 %v702_v0 }
  0x59   :  { %509 = vmatpush3.bf16.msra.mxu0 %v572_v12  ;;  %529 = vmatpush3.bf16.msra.mxu1 %v581_v16 }
  0x5a   :  { %510 = vmatprep.subr.bf16.mxu0 %v702_v0  ;;  %530 = vmatprep.subr.bf16.mxu1 %v702_v0 }
  0x5d   :  { %511 = vmatpush3.bf16.msra.mxu0 %v574_v14  ;;  %531 = vmatpush3.bf16.msra.mxu1 %v582_v17 }
  0x5e   :  { %536 = vmatprep.subr.bf16.mxu0 %v702_v0 }
  0x60   :  { %513 = vmatmul.mubr.bf16.vlgmr.msra.gmra.mrb[0].mxu0 %v576_v15  ;;  %533 = vmatmul.mubr.bf16.vlgmr.msra.gmra.mrb[0].mxu1 %v576_v15 }
  0x61   :  { %552 = vmatprep.mubr.msk.bf16.mxu0 %vm703_vm0, %v702_v0  ;;  %537 = vmatpush3.bf16.msra.mxu0 %v583_v18 }
  0x62   :  { %538 = vmatprep.subr.bf16.mxu0 %v702_v0 }
  0x65   :  { %539 = vmatpush3.bf16.msra.mxu0 %v584_v19 }
  0x66   :  { %540 = vmatprep.subr.bf16.mxu0 %v702_v0 }
  0x69   :  { %541 = vmatpush3.bf16.msra.mxu0 %v585_v20 }
  0x6a   :  { %542 = vmatprep.subr.bf16.mxu0 %v702_v0 }
  0x6d   :  { %543 = vmatpush3.bf16.msra.mxu0 %v586_v21 }
  0x6e   :  { %544 = vmatprep.subr.bf16.mxu0 %v702_v0 }
  0x71   :  { %545 = vmatpush3.bf16.msra.mxu0 %v587_v22 }
  0x72   :  { %546 = vmatprep.subr.bf16.mxu0 %v702_v0 }
  0x75   :  { %547 = vmatpush3.bf16.msra.mxu0 %v588_v23 }
  0x76   :  { %548 = vmatprep.subr.bf16.mxu0 %v702_v0 }
  0x79   :  { %549 = vmatpush3.bf16.msra.mxu0 %v589_v24 }
  0x7a   :  { %550 = vmatprep.subr.bf16.mxu0 %v702_v0 }
  0x7d   :  { %551 = vmatpush3.bf16.msra.mxu0 %v590_v25 }
 0x133   :  { %v176_v26 = vpop.f32.mrb[0].mxu0  ;;  %v281_v32 = vpop.f32.mrb[0].mxu1 }
 0x134   :  { %v459_v27 = vmul.f32 -1.442695, %v176_v26  ;;  %v514_v28 = vpop.f32.mrb[1].mxu0  ;;  %v534_v33 = vpop.f32.mrb[1].mxu1 }
 0x135   :  { %v179_v29 = vpop.f32.mrb[2].mxu0  ;;  %v284_v34 = vpop.f32.mrb[2].mxu1 }
 0x136   :  { %591 = vpow2.f32 %v459_v27  ;;  %v460_v30 = vmul.f32 -1.442695, %v179_v29  ;;  %v515_v31 = vpop.f32.mrb[3].mxu0  ;;  %v535_v35 = vpop.f32.mrb[3].mxu1 }
 0x138   :  { %593 = vpow2.f32 %v460_v30 }
 0x140   :  { %v592_v36 = vpop.eup %591 }
 0x141   :  { %v294_v37 = vadd.f32 1.0, %v592_v36 }
 0x142   :  { %v594_v38 = vpop.eup %593 }
 0x143   :  { %595 = vrcp.f32 %v294_v37  ;;  %v295_v39 = vadd.f32 1.0, %v594_v38 }
 0x145   :  { %597 = vrcp.f32 %v295_v39 }
 0x14d   :  { %v596_v40 = vpop.eup %595 }
 0x14e   :  { %v300_v41 = vmul.f32 %v596_v40, %v176_v26 }
 0x14f   :  { %v598_v42 = vpop.eup %597 }
 0x150   :  { %v301_v43 = vmul.f32 %v598_v42, %v179_v29  ;;  %v302_v44 = vmul.f32 %v300_v41, %v281_v32 }
 0x152   :  { %v303_v45 = vmul.f32 %v301_v43, %v284_v34 }
 0x154   :  { %v306_v46 = vpack.c.bf16 %v303_v45, %v302_v44 }
 0x156   :  { %553 = vmatmul.mubr.bf16.vlgmr.msra.gmra.mrb[4].mxu0 %v306_v46 }
 0x229   :  { %v405_v47 = vpop.f32.mrb[4].mxu0 }
 0x22a   :  { %421 = vst [vmem:[#allocation9] sm:$0xff] %v405_v47  ;;  %v554_v48 = vpop.f32.mrb[5].mxu0 }
 0x22b   :  { %v408_v49 = vpop.f32.mrb[6].mxu0 }
 0x22c   :  { %422 = vst [vmem:[#allocation9 + $0x8] sm:$0xff] %v408_v49  ;;  %v555_v50 = vpop.f32.mrb[7].mxu0 }
 0x22d   :  { %679 = shalt.err (!%p676_p6)
}
 0x22e   :  { %s680_s10 = scalar_lea.hbm %s843_s4, 256 }
 0x22f   :  { %p681_p7 = scmp.ne.s32.totalorder %s843_s4, %s680_s10  ;;  %p684_p8 = scmp.lt.u32.totalorder %s680_s10, %s843_s4 }
 0x231   :  { %p686_p9 = pnand %p684_p8, %p681_p7 }
 0x233   :  { %689 = shalt.err (!%p686_p9)
}
 0x234   :  { %s705_s15 = smov 8  }
 0x235   :  { %434 = dma.vmem_to_hbm [thread:$0]  %s429_s7, 256, %s843_s4, [#allocation5], %s698_s5, %s698_s5, %s705_s15  }
 0x236   :  { %694 = dma.done.wait [#allocation5], 256  }
 0x237   :  { %695 = vsyncadd [#allocation5], 4294967040 }
 0x238   :  { %438 = vsyncpa [#allocation4], 1 }
 0x239   :  { %439 = vsyncpa [#allocation7], 1 }
 0x23a   :  { %440 = vsyncpa [#allocation5], 1 }

</bundles_post_ra>
